<compile_context>
chip_gen: v6e
topology: v6e:2x2x1
jax: 0.10.0
libtpu: 0.0.40
codegen_flags: <defaults>
</compile_context>

<pallas_src>
import functools
import math

import jax
import jax.numpy as jnp
from jax.experimental import pallas as pl
from jax.experimental.pallas import tpu as pltpu


def _t2v_kernel(tau_ref, w_ref, b_ref, out_ref, *, K):
    """Fused Time2Vec tile.

    tau_ref: (TRp, p*F)    packed input rows (p logical rows per physical row)
    w_ref:   (p*F, p*K)    block-diagonal fused weights [w | w0] (VMEM-resident)
    b_ref:   (period, p*K) packed fused bias [b | b0]            (VMEM-resident)
    out_ref: (TRp, p*K)    packed, lane-dense output
    """
    x = jnp.dot(tau_ref[...], w_ref[...], preferred_element_type=jnp.float32)
    trp, pk = x.shape

    bias = b_ref[...]
    if bias.shape[0] != 1 and bias.shape[0] != trp:
        # Tile-aligned by construction: trp is a multiple of the bias period.
        bias = jnp.tile(bias, (trp // bias.shape[0], 1))
    x = x + bias

    lane = jax.lax.broadcasted_iota(jnp.int32, x.shape, dimension=1)
    # sin on the first K-1 lanes of each packed K-block (periodic part),
    # identity on the last lane (linear part).
    y = jnp.where((lane % K) < (K - 1), jnp.sin(x), x)
    out_ref[...] = y.astype(out_ref.dtype)  # one lane-dense store of the block


def _choose_pack(R, F, K):
    """Logical rows packed per physical row (lane-dense output / input)."""
    p = 1
    if K <= 128 and 128 % K == 0 and R % (128 // K) == 0:
        p = 128 // K  # output width becomes exactly 128 lanes
    # Grow p (powers of two) toward a lane-dense tau slab while the packing
    # still divides the row count and the block-diagonal weight stays small.
    while R % (2 * p) == 0 and (2 * p) * F <= 128 and (2 * p) * K <= 512:
        p *= 2
    return p


def _choose_tile(Rp, period, target_packed_rows):
    """Packed-row tile: multiple of lcm(8, bias period), >=2 grid steps if possible."""
    unit = (8 * period) // math.gcd(8, period)  # lcm(8, period)
    if Rp <= unit:
        return Rp  # single block; block shape == full array dims
    t = min(target_packed_rows, Rp // 2) // unit * unit
    return max(unit, t)


def positional_embedding(tau, w, b, w0, b0, *, target_rows_per_tile=8192):
    """Time2Vec forward: tau (B, S, F) -> (B, S, out_features)."""
    B, S, F = tau.shape
    K1 = w.shape[1]  # out_features - 1
    K = K1 + 1

    # PyTorch's bias broadcast (B,S,K1) + (F,K1) is only valid when S == F,
    # which is what the original module implicitly assumes.
    assert S == F, "Time2Vec bias broadcast requires seq == in_features"

    # Fuse the (F,1) linear head into the periodic matmul: one MXU pass.
    w_full = jnp.concatenate([w, w0], axis=-1).astype(jnp.float32)   # (F, K)
    b_full = jnp.concatenate([b, b0], axis=-1).astype(jnp.float32)   # (S, K)

    R = B * S
    p = _choose_pack(R, F, K)
    PF, PK = p * F, p * K
    Rp = R // p

    # Block-diagonal weights: one matmul emits p packed output rows per row.
    w_big = jnp.kron(jnp.eye(p, dtype=jnp.float32), w_full)          # (PF, PK)

    # Packed bias: row q, cols j*K:(j+1)*K hold b_full[(q*p + j) % S].
    # Period (in packed rows) = lcm(S, p) / p; R % p == 0 guarantees alignment.
    L = (S * p) // math.gcd(S, p)
    period = L // p
    b_packed = b_full[jnp.arange(L) % S].reshape(period, PK)

    # Pack the input: p consecutive logical rows per physical row.
    tau_packed = tau.reshape(Rp, PF)

    target_packed = max(1, target_rows_per_tile // p)
    TRp = _choose_tile(Rp, period, target_packed)
    grid = (pl.cdiv(Rp, TRp),)

    out = pl.pallas_call(
        functools.partial(_t2v_kernel, K=K),
        out_shape=jax.ShapeDtypeStruct((Rp, PK), tau.dtype),
        grid=grid,
        in_specs=[
            pl.BlockSpec((TRp, PF), lambda i: (i, 0)),     # packed tau rows
            pl.BlockSpec((PF, PK), lambda i: (0, 0)),      # weights, VMEM-resident
            pl.BlockSpec((period, PK), lambda i: (0, 0)),  # bias, VMEM-resident
        ],
        out_specs=pl.BlockSpec((TRp, PK), lambda i: (i, 0)),
        compiler_params=pltpu.CompilerParams(
            dimension_semantics=("parallel",),
        ),
    )(tau_packed, w_big, b_packed)

    # Packed output is a contiguous view of the (B, S, K) result.
    return out.reshape(B, S, K)


def positional_embedding_ref(tau, w, b, w0, b0):
    """Pure-JAX reference (mirrors the PyTorch t2v exactly)."""
    v1 = jnp.sin(jnp.matmul(tau, w) + b)
    v2 = jnp.matmul(tau, w0) + b0
    return jnp.concatenate([v1, v2], axis=-1)


def _make_inputs(key, batch, seq, in_features, out_features):
    k_tau, k_w0, k_b0, k_w, k_b = jax.random.split(key, 5)
    d = 0.01  # matches nn.init.uniform_(param, a=-d, b=d)
    w0 = jax.random.uniform(k_w0, (in_features, 1), jnp.float32, -d, d)
    b0 = jax.random.uniform(k_b0, (in_features, 1), jnp.float32, -d, d)
    w = jax.random.uniform(k_w, (in_features, out_features - 1), jnp.float32, -d, d)
    b = jax.random.uniform(k_b, (in_features, out_features - 1), jnp.float32, -d, d)
    tau = jax.random.normal(k_tau, (batch, seq, in_features), jnp.float32)
    return tau, w, b, w0, b0


if __name__ == "__main__":
    key = jax.random.PRNGKey(0)
    k_small, k_mid = jax.random.split(key)

    # Small shapes implied by the module: in_features == seq (required by the
    # PyTorch bias broadcast), out_features = hidden.
    tau, w, b, w0, b0 = _make_inputs(k_small, batch=2, seq=8,
                                     in_features=8, out_features=32)
    out = jax.block_until_ready(positional_embedding(tau, w, b, w0, b0))
    ref = positional_embedding_ref(tau, w, b, w0, b0)
    assert out.shape == (2, 8, 32)
    assert jnp.allclose(out, ref, atol=1e-5, rtol=1e-5), "mismatch vs reference (small)"

    # Slightly larger case: exercises multi-step grid + in-kernel bias tiling.
    tau2, w2, b2, w02, b02 = _make_inputs(k_mid, batch=16, seq=16,
                                          in_features=16, out_features=32)
    out2 = jax.block_until_ready(positional_embedding(tau2, w2, b2, w02, b02))
    ref2 = positional_embedding_ref(tau2, w2, b2, w02, b02)
    assert out2.shape == (16, 16, 32)
    assert jnp.allclose(out2, ref2, atol=1e-5, rtol=1e-5), "mismatch vs reference (mid)"

    print("KERNEL_OK")
</pallas_src>

<mosaic_0001>
module attributes {stable_mosaic.version = 11 : i64} {
  func.func @_t2v_kernel(%arg0: i32, %arg1: memref<1x128xf32, #tpu.memory_space<vmem>>, %arg2: memref<128x512xf32, #tpu.memory_space<vmem>>, %arg3: memref<1x512xf32, #tpu.memory_space<vmem>>, %arg4: memref<1x512xf32, #tpu.memory_space<vmem>>) attributes {dimension_semantics = [#tpu.dimension_semantics<parallel>], iteration_bounds = array<i64: 1>, scalar_prefetch = 0 : i64, scratch_operands = 0 : i64, tpu.core_type = #tpu.core_type<tc>, window_params = [{transform_indices = @transform_0, window_bounds = array<i64: 1, 128>}, {pipeline_mode = #tpu.pipeline_mode<synchronous>, transform_indices = @transform_1, window_bounds = array<i64: 128, 512>}, {pipeline_mode = #tpu.pipeline_mode<synchronous>, transform_indices = @transform_2, window_bounds = array<i64: 1, 512>}, {transform_indices = @transform_3, window_bounds = array<i64: 1, 512>}]} {
    %c0 = arith.constant 0 : index
    %c0_0 = arith.constant 0 : index
    %0 = vector.load %arg1[%c0, %c0_0] : memref<1x128xf32, #tpu.memory_space<vmem>>, vector<1x128xf32>
    %c0_1 = arith.constant 0 : index
    %c0_2 = arith.constant 0 : index
    %1 = vector.load %arg2[%c0_1, %c0_2] : memref<128x512xf32, #tpu.memory_space<vmem>>, vector<128x512xf32>
    %cst = arith.constant dense<0.000000e+00> : vector<1x512xf32>
    %2 = tpu.matmul %0, %1, %cst {dimension_numbers = #tpu.dot_dimension_numbers<[1], [0], [0], [1], [0, 0, 1, 1], [], []>} : vector<1x128xf32>, vector<128x512xf32>, vector<1x512xf32> -> vector<1x512xf32>
    %c0_3 = arith.constant 0 : index
    %c0_4 = arith.constant 0 : index
    %3 = vector.load %arg3[%c0_3, %c0_4] : memref<1x512xf32, #tpu.memory_space<vmem>>, vector<1x512xf32>
    %4 = arith.addf %2, %3 : vector<1x512xf32>
    %5 = tpu.iota {dimensions = array<i32: 1>} : vector<1x512xi32>
    %c32_i32 = arith.constant 32 : i32
    %c0_i32 = arith.constant 0 : i32
    %6 = arith.cmpi eq, %c32_i32, %c0_i32 : i32
    %c1_i32 = arith.constant 1 : i32
    %7 = arith.select %6, %c1_i32, %c32_i32 : i32
    %8 = vector.broadcast %7 : i32 to vector<1x512xi32>
    %9 = arith.remsi %5, %8 : vector<1x512xi32>
    %c0_i32_5 = arith.constant 0 : i32
    %10 = vector.broadcast %c0_i32_5 : i32 to vector<1x512xi32>
    %11 = arith.cmpi ne, %9, %10 : vector<1x512xi32>
    %c0_i32_6 = arith.constant 0 : i32
    %12 = vector.broadcast %c0_i32_6 : i32 to vector<1x512xi32>
    %13 = arith.cmpi slt, %9, %12 : vector<1x512xi32>
    %c0_i32_7 = arith.constant 0 : i32
    %14 = arith.cmpi slt, %7, %c0_i32_7 : i32
    %15 = vector.broadcast %14 : i1 to vector<1x512xi1>
    %16 = vector.broadcast %15 : vector<1x512xi1> to vector<1x512xi1>
    %17 = arith.xori %13, %16 : vector<1x512xi1>
    %18 = arith.andi %17, %11 : vector<1x512xi1>
    %19 = vector.broadcast %7 : i32 to vector<1x512xi32>
    %20 = arith.addi %9, %19 : vector<1x512xi32>
    %21 = arith.select %18, %20, %9 : vector<1x512xi1>, vector<1x512xi32>
    %c31_i32 = arith.constant 31 : i32
    %22 = vector.broadcast %c31_i32 : i32 to vector<1x512xi32>
    %23 = arith.cmpi slt, %21, %22 : vector<1x512xi32>
    %24 = math.sin %4 : vector<1x512xf32>
    %25 = arith.select %23, %24, %4 : vector<1x512xi1>, vector<1x512xf32>
    %c0_8 = arith.constant 0 : index
    %c0_9 = arith.constant 0 : index
    %26 = vector.load %arg4[%c0_8, %c0_9] : memref<1x512xf32, #tpu.memory_space<vmem>>, vector<1x512xf32>
    tpu.vector_store %arg4[%c0_8, %c0_9], %25 {strides = array<i32>} : memref<1x512xf32, #tpu.memory_space<vmem>>, vector<1x512xf32>,
    return
  }
  func.func @transform_0(%arg0: i32) -> (i32, i32) {
    %c0_i32 = arith.constant 0 : i32
    %c0_i32_0 = arith.constant 0 : i32
    return %arg0, %c0_i32 : i32, i32
  }
  func.func @transform_1(%arg0: i32) -> (i32, i32) {
    %c0_i32 = arith.constant 0 : i32
    %c0_i32_0 = arith.constant 0 : i32
    %c0_i32_1 = arith.constant 0 : i32
    return %c0_i32, %c0_i32_0 : i32, i32
  }
  func.func @transform_2(%arg0: i32) -> (i32, i32) {
    %c0_i32 = arith.constant 0 : i32
    %c0_i32_0 = arith.constant 0 : i32
    %c0_i32_1 = arith.constant 0 : i32
    return %c0_i32, %c0_i32_0 : i32, i32
  }
  func.func @transform_3(%arg0: i32) -> (i32, i32) {
    %c0_i32 = arith.constant 0 : i32
    %c0_i32_0 = arith.constant 0 : i32
    return %arg0, %c0_i32 : i32, i32
  }
}

</mosaic_0001>

<bundles_post_ra>
// kernel: tpu_custom_call.1
= control target key start
LH: loop header
LB: loop body
LE: loop exit
PB: predicated region body
PF: predicated region fallthrough
CT: control target
= control target key end

     0   :  { %8 = vsyncpa [#allocation3], 0  ;;  %s1317_s0 = inlined_call_operand.hbm [shape: f32[1,128], index: 0, kind: input, shape index: {}]   ;;  %s1318_s1 = inlined_call_operand.hbm [shape: f32[128,512], index: 1, kind: input, shape index: {}]   ;;  %s1319_s2 = inlined_call_operand.hbm [shape: f32[1,512], index: 2, kind: input, shape index: {}]   ;;  %s1320_s3 = inlined_call_operand.hbm [shape: f32[1,512], index: 3, kind: output, shape index: {}]  }
   0x1   :  { %9 = vsyncpa [#allocation6], 0 }
   0x2   :  { %10 = vsyncpa [#allocation4], 0  ;;  %s956_s12 = smov [#allocation5]  }
   0x3   :  { %s26_s13 = sshll.u32 %s956_s12, 4  ;;  %s27_s13 = int_to_ptr.vmem [resolvable:$true] %s26_s13 }
   0x4   :  { %s878_s14 = scalar_lea.vmem %s27_s13, 8192  ;;  %p883_p1 = scmp.lt.s32.totalorder %s27_s13, %s27_s13 }
   0x5   :  { %p879_p0 = scmp.ne.s32.totalorder %s27_s13, %s878_s14  ;;  %p884_p2 = scmp.lt.s32.totalorder %s878_s14, %s878_s14 }
   0x7   :  { %p885_p3 = por %p884_p2, %p883_p1 }
   0x9   :  { %p886_p4 = pnand %p885_p3, %p879_p0 }
   0xb   :  { %889 = shalt.err (!%p886_p4)
}
   0xc   :  { %s957_s15 = smov 512   ;;  %s958_s16 = smov 32  }
   0xd   :  { %32 = dma.hbm_to_vmem [thread:$0]  %s1318_s1, 8192, %s27_s13, [#allocation6], %s957_s15, %s957_s15, %s958_s16  }
   0xe   :  { %s959_s19 = smov [#allocation2]   ;;  %s960_s21 = smov [#allocation7]  }
   0xf   :  { %s17_s20 = sshll.u32 %s959_s19, 4  ;;  %s39_s22 = sshll.u32 %s960_s21, 4  ;;  %s18_s20 = int_to_ptr.vmem [resolvable:$true] %s17_s20  ;;  %s40_s22 = int_to_ptr.vmem [resolvable:$true] %s39_s22 }
  0x10   :  { %s898_s23 = scalar_lea.vmem %s18_s20, 16  ;;  %s902_s24 = scalar_lea.vmem %s18_s20, 32 }
  0x11   :  { %p899_p5 = scmp.ne.s32.totalorder %s18_s20, %s898_s23  ;;  %p903_p6 = scmp.lt.s32.totalorder %s18_s20, %s18_s20 }
  0x12   :  { %p904_p7 = scmp.lt.s32.totalorder %s902_s24, %s898_s23 }
  0x14   :  { %p905_p8 = por %p904_p7, %p903_p6 }
  0x16   :  { %p906_p9 = pnand %p905_p8, %p899_p5 }
  0x18   :  { %909 = shalt.err (!%p906_p9)
}
  0x19   :  { %20 = dma.hbm_to_vmem [thread:$0]  %s1317_s0, 16, %s18_s20, [#allocation3]  }
  0x1a   :  { %s918_s27 = scalar_lea.vmem %s40_s22, 64  ;;  %p923_p11 = scmp.lt.s32.totalorder %s40_s22, %s40_s22 }
  0x1b   :  { %p919_p10 = scmp.ne.s32.totalorder %s40_s22, %s918_s27  ;;  %p924_p12 = scmp.lt.s32.totalorder %s918_s27, %s918_s27 }
  0x1d   :  { %p925_p13 = por %p924_p12, %p923_p11 }
  0x1f   :  { %p926_p0 = pnand %p925_p13, %p919_p10 }
  0x21   :  { %929 = shalt.err (!%p926_p0)
}
  0x22   :  { %42 = dma.hbm_to_vmem [thread:$0]  %s1319_s2, 64, %s40_s22, [#allocation6]  }
  0x23   :  { %950 = dma.done.wait [#allocation3], 16  }
  0x24   :  { %951 = vsyncadd [#allocation3], 4294967280 }
  0x25   :  { %952 = dma.done.wait [#allocation6], 8256  }
  0x26   :  { %953 = vsyncadd [#allocation6], 4294959040  ;;  %v961_v0 = vmov 0.0   ;;  %v114_v1 = vld [vmem:[#allocation5 + $0x1e8] sm:$0xff]  ;;  %v116_v2 = vld [vmem:[#allocation5 + $0x1f8] sm:$0xff]  ;;  %s969_s0 = smov [#allocation8]  }
  0x27   :  { %203 = vmatprep.mubr.f32.mxu0 %v961_v0  ;;  %274 = vmatprep.mubr.f32.mxu1 %v961_v0  ;;  %v113_v3 = vld [vmem:[#allocation5 + $0x1e0] sm:$0xff]  ;;  %v115_v4 = vld [vmem:[#allocation5 + $0x1f0] sm:$0xff]  ;;  %v110_v5 = vld [vmem:[#allocation5 + $0x1c8] sm:$0xff]  ;;  %s798_s2 = sshll.u32 %s969_s0, 4  ;;  %s799_s2 = int_to_ptr.vmem [resolvable:$true] %s798_s2 }
  0x28   :  { %139 = vmatprep.subr.mxu0 %v114_v1  ;;  %210 = vmatprep.subr.mxu1 %v116_v2  ;;  %v112_v6 = vld [vmem:[#allocation5 + $0x1d8] sm:$0xff]  ;;  %v109_v7 = vld [vmem:[#allocation5 + $0x1c0] sm:$0xff]  ;;  %v111_v8 = vld [vmem:[#allocation5 + $0x1d0] sm:$0xff]  ;;  %v119_v2 = vlaneseq  ;;  %s930_s29 = scalar_lea.vmem %s799_s2, 64  ;;  %p935_p2 = scmp.lt.s32.totalorder %s799_s2, %s799_s2 }
  0x29   :  { %140 = vmatpush1.msra.mxu0 %v113_v3  ;;  %211 = vmatpush1.msra.mxu1 %v115_v4  ;;  %v106_v9 = vld [vmem:[#allocation5 + $0x1a8] sm:$0xff]  ;;  %v108_v10 = vld [vmem:[#allocation5 + $0x1b8] sm:$0xff]  ;;  %v105_v11 = vld [vmem:[#allocation5 + $0x1a0] sm:$0xff]  ;;  %p931_p1 = scmp.ne.s32.totalorder %s799_s2, %s930_s29  ;;  %p936_p3 = scmp.lt.s32.totalorder %s930_s29, %s930_s29 }
  0x2a   :  { %141 = vmatprep.subr.mxu0 %v110_v5  ;;  %212 = vmatprep.subr.mxu1 %v112_v6  ;;  %v107_v12 = vld [vmem:[#allocation5 + $0x1b0] sm:$0xff]  ;;  %v102_v13 = vld [vmem:[#allocation5 + $0x188] sm:$0xff]  ;;  %v104_v14 = vld [vmem:[#allocation5 + $0x198] sm:$0xff]  ;;  %v1000_v3 = vshrl.u32 %v119_v2, 7 }
  0x2b   :  { %142 = vmatpush1.msra.mxu0 %v109_v7  ;;  %213 = vmatpush1.msra.mxu1 %v111_v8  ;;  %v101_v15 = vld [vmem:[#allocation5 + $0x180] sm:$0xff]  ;;  %v103_v16 = vld [vmem:[#allocation5 + $0x190] sm:$0xff]  ;;  %v98_v17 = vld [vmem:[#allocation5 + $0x168] sm:$0xff]  ;;  %p937_p4 = por %p936_p3, %p935_p2 }
  0x2c   :  { %143 = vmatprep.subr.mxu0 %v106_v9  ;;  %214 = vmatprep.subr.mxu1 %v108_v10  ;;  %v100_v18 = vld [vmem:[#allocation5 + $0x178] sm:$0xff]  ;;  %v97_v19 = vld [vmem:[#allocation5 + $0x160] sm:$0xff]  ;;  %v99_v20 = vld [vmem:[#allocation5 + $0x170] sm:$0xff]  ;;  %v121_v4 = vsub.s32 0, %v1000_v3  ;;  %v129_v5 = vsub.s32 2, %v1000_v3  ;;  %v125_v7 = vsub.s32 1, %v1000_v3 }
  0x2d   :  { %144 = vmatpush1.msra.mxu0 %v105_v11  ;;  %215 = vmatpush1.msra.mxu1 %v107_v12  ;;  %v94_v21 = vld [vmem:[#allocation5 + $0x148] sm:$0xff]  ;;  %v96_v22 = vld [vmem:[#allocation5 + $0x158] sm:$0xff]  ;;  %v93_v23 = vld [vmem:[#allocation5 + $0x140] sm:$0xff]  ;;  %p938_p5 = pnand %p937_p4, %p931_p1 }
  0x2e   :  { %145 = vmatprep.subr.mxu0 %v102_v13  ;;  %216 = vmatprep.subr.mxu1 %v104_v14  ;;  %v95_v24 = vld [vmem:[#allocation5 + $0x150] sm:$0xff]  ;;  %v90_v25 = vld [vmem:[#allocation5 + $0x128] sm:$0xff]  ;;  %v92_v26 = vld [vmem:[#allocation5 + $0x138] sm:$0xff] }
  0x2f   :  { %146 = vmatpush1.msra.mxu0 %v101_v15  ;;  %217 = vmatpush1.msra.mxu1 %v103_v16  ;;  %v89_v27 = vld [vmem:[#allocation5 + $0x120] sm:$0xff]  ;;  %v91_v28 = vld [vmem:[#allocation5 + $0x130] sm:$0xff]  ;;  %v86_v29 = vld [vmem:[#allocation5 + $0x108] sm:$0xff] }
  0x30   :  { %147 = vmatprep.subr.mxu0 %v98_v17  ;;  %218 = vmatprep.subr.mxu1 %v100_v18  ;;  %v88_v30 = vld [vmem:[#allocation5 + $0x118] sm:$0xff]  ;;  %v85_v31 = vld [vmem:[#allocation5 + $0x100] sm:$0xff]  ;;  %v87_v32 = vld [vmem:[#allocation5 + $0x110] sm:$0xff] }
  0x31   :  { %148 = vmatpush1.msra.mxu0 %v97_v19  ;;  %219 = vmatpush1.msra.mxu1 %v99_v20  ;;  %v82_v33 = vld [vmem:[#allocation5 + $0xe8] sm:$0xff]  ;;  %v84_v34 = vld [vmem:[#allocation5 + $0xf8] sm:$0xff]  ;;  %v81_v35 = vld [vmem:[#allocation5 + $0xe0] sm:$0xff] }
  0x32   :  { %149 = vmatprep.subr.mxu0 %v94_v21  ;;  %220 = vmatprep.subr.mxu1 %v96_v22  ;;  %v83_v36 = vld [vmem:[#allocation5 + $0xf0] sm:$0xff]  ;;  %v78_v37 = vld [vmem:[#allocation5 + $0xc8] sm:$0xff]  ;;  %v80_v38 = vld [vmem:[#allocation5 + $0xd8] sm:$0xff] }
  0x33   :  { %150 = vmatpush1.msra.mxu0 %v93_v23  ;;  %221 = vmatpush1.msra.mxu1 %v95_v24  ;;  %v77_v39 = vld [vmem:[#allocation5 + $0xc0] sm:$0xff]  ;;  %v79_v40 = vld [vmem:[#allocation5 + $0xd0] sm:$0xff]  ;;  %v74_v41 = vld [vmem:[#allocation5 + $0xa8] sm:$0xff] }
  0x34   :  { %151 = vmatprep.subr.mxu0 %v90_v25  ;;  %222 = vmatprep.subr.mxu1 %v92_v26  ;;  %v76_v42 = vld [vmem:[#allocation5 + $0xb8] sm:$0xff]  ;;  %v73_v43 = vld [vmem:[#allocation5 + $0xa0] sm:$0xff]  ;;  %v75_v44 = vld [vmem:[#allocation5 + $0xb0] sm:$0xff] }
  0x35   :  { %152 = vmatpush1.msra.mxu0 %v89_v27  ;;  %223 = vmatpush1.msra.mxu1 %v91_v28  ;;  %v70_v45 = vld [vmem:[#allocation5 + $0x88] sm:$0xff]  ;;  %v72_v46 = vld [vmem:[#allocation5 + $0x98] sm:$0xff]  ;;  %v69_v47 = vld [vmem:[#allocation5 + $0x80] sm:$0xff] }
  0x36   :  { %153 = vmatprep.subr.mxu0 %v86_v29  ;;  %224 = vmatprep.subr.mxu1 %v88_v30  ;;  %v71_v48 = vld [vmem:[#allocation5 + $0x90] sm:$0xff]  ;;  %v66_v49 = vld [vmem:[#allocation5 + $0x68] sm:$0xff]  ;;  %v68_v50 = vld [vmem:[#allocation5 + $0x78] sm:$0xff] }
  0x37   :  { %154 = vmatpush1.msra.mxu0 %v85_v31  ;;  %225 = vmatpush1.msra.mxu1 %v87_v32  ;;  %v65_v51 = vld [vmem:[#allocation5 + $0x60] sm:$0xff]  ;;  %v67_v52 = vld [vmem:[#allocation5 + $0x70] sm:$0xff]  ;;  %v62_v53 = vld [vmem:[#allocation5 + $0x48] sm:$0xff] }
  0x38   :  { %155 = vmatprep.subr.mxu0 %v82_v33  ;;  %226 = vmatprep.subr.mxu1 %v84_v34  ;;  %v64_v54 = vld [vmem:[#allocation5 + $0x58] sm:$0xff]  ;;  %v61_v55 = vld [vmem:[#allocation5 + $0x40] sm:$0xff]  ;;  %v63_v56 = vld [vmem:[#allocation5 + $0x50] sm:$0xff]  ;;  %v133_v33 = vsub.s32 3, %v1000_v3 }
  0x39   :  { %156 = vmatpush1.msra.mxu0 %v81_v35  ;;  %227 = vmatpush1.msra.mxu1 %v83_v36  ;;  %v58_v57 = vld [vmem:[#allocation5 + $0x28] sm:$0xff]  ;;  %v60_v58 = vld [vmem:[#allocation5 + $0x38] sm:$0xff]  ;;  %v57_v59 = vld [vmem:[#allocation5 + $0x20] sm:$0xff] }
  0x3a   :  { %157 = vmatprep.subr.mxu0 %v78_v37  ;;  %228 = vmatprep.subr.mxu1 %v80_v38  ;;  %v59_v60 = vld [vmem:[#allocation5 + $0x30] sm:$0xff]  ;;  %v54_v61 = vld [vmem:[#allocation5 + $0x8] sm:$0xff]  ;;  %v56_v62 = vld [vmem:[#allocation5 + $0x18] sm:$0xff] }
  0x3b   :  { %158 = vmatpush1.msra.mxu0 %v77_v39  ;;  %229 = vmatpush1.msra.mxu1 %v79_v40  ;;  %v53_v63 = vld [vmem:[#allocation5] sm:$0xff]  ;;  %v55_v0 = vld [vmem:[#allocation5 + $0x10] sm:$0xff]  ;;  %v52_v1 = vld [vmem:[#allocation2] sm:$0x1] }
  0x3c   :  { %159 = vmatprep.subr.mxu0 %v74_v41  ;;  %230 = vmatprep.subr.mxu1 %v76_v42  ;;  %v117_v6 = vld [vmem:[#allocation7] sm:$0xf] }
  0x3d   :  { %160 = vmatpush1.msra.mxu0 %v73_v43  ;;  %231 = vmatpush1.msra.mxu1 %v75_v44  ;;  %v122_v8 = vrot.slane %v117_v6, %v121_v4  ;;  %v130_v9 = vrot.slane %v117_v6, %v129_v5  ;;  %v126_v12 = vrot.slane %v117_v6, %v125_v7  ;;  %v962_v44 = vmov 683565275  }
  0x3e   :  { %161 = vmatprep.subr.mxu0 %v70_v45  ;;  %232 = vmatprep.subr.mxu1 %v72_v46  ;;  %v1027_v42 = vrot.slane %v117_v6, %v133_v33 }
  0x3f   :  { %162 = vmatpush1.msra.mxu0 %v69_v47  ;;  %233 = vmatpush1.msra.mxu1 %v71_v48  ;;  %v963_v48 = vmov 2475754826  }
  0x40   :  { %163 = vmatprep.subr.mxu0 %v66_v49  ;;  %234 = vmatprep.subr.mxu1 %v68_v50  ;;  %v964_v50 = vmov 2131351028  }
  0x41   :  { %164 = vmatpush1.msra.mxu0 %v65_v51  ;;  %235 = vmatpush1.msra.mxu1 %v67_v52  ;;  %v965_v52 = vmov 2102212464  }
  0x42   :  { %165 = vmatprep.subr.mxu0 %v62_v53  ;;  %236 = vmatprep.subr.mxu1 %v64_v54  ;;  %v966_v54 = vmov 920167782  }
  0x43   :  { %166 = vmatpush1.msra.mxu0 %v61_v55  ;;  %237 = vmatpush1.msra.mxu1 %v63_v56 }
  0x44   :  { %167 = vmatprep.subr.mxu0 %v58_v57  ;;  %238 = vmatprep.subr.mxu1 %v60_v58 }
  0x45   :  { %168 = vmatpush1.msra.mxu0 %v57_v59  ;;  %239 = vmatpush1.msra.mxu1 %v59_v60 }
  0x46   :  { %169 = vmatprep.subr.mxu0 %v54_v61  ;;  %240 = vmatprep.subr.mxu1 %v56_v62  ;;  %v967_v61 = vmov 1326507024  }
  0x47   :  { %170 = vmatpush1.msra.mxu0 %v53_v63  ;;  %241 = vmatpush1.msra.mxu1 %v55_v0 }
  0x48   :  { %204 = vmatmul.mubr.f32.vlgmr.msra.gmra.mxu0 %v52_v1  ;;  %275 = vmatmul.mubr.f32.vlgmr.msra.gmra.mxu1 %v52_v1 }
 0x108   :  { %v205_v10 = vpop.f32.mrf.mxu0  ;;  %v276_v11 = vpop.f32.mrf.mxu1 }
 0x109   :  { %v1005_v13 = vadd.f32 %v205_v10, %v122_v8  ;;  %v1007_v14 = vadd.f32 %v276_v11, %v130_v9 }
 0x10a   :  { %v207_v15 = vpop.f32.mrf.mxu0 }
 0x10b   :  { %v338_v16 = vand.u32 2147483647, %v1005_v13  ;;  %v341_v17 = vand.u32 2139095040, %v1005_v13  ;;  %v546_v18 = vand.u32 2147483647, %v1007_v14  ;;  %v549_v19 = vand.u32 2139095040, %v1007_v14 }
 0x10c   :  { %v1013_v20 = vadd.f32 %v207_v15, %v126_v12 }
 0x10d   :  { %v342_v21 = vshrl.u32 %v341_v17, 23  ;;  %v345_v22 = vand.u32 8388607, %v338_v16  ;;  %v550_v23 = vshrl.u32 %v549_v19, 23  ;;  %v553_v24 = vand.u32 8388607, %v546_v18 }
 0x10e   :  { %v445_v26 = vand.u32 2139095040, %v1013_v20 }
 0x10f   :  { %v808_v25 = vadd.s32 4294967169, %v342_v21  ;;  %v816_v27 = vadd.s32 4294967169, %v550_v23  ;;  %v346_v30 = vor.u32 8388608, %v345_v22  ;;  %v554_v31 = vor.u32 8388608, %v553_v24 }
 0x110   :  { %v446_v29 = vshrl.u32 %v445_v26, 23 }
 0x111   :  { %v348_v28 = vadd.s32 1, %v808_v25  ;;  %v556_v32 = vadd.s32 1, %v816_v27  ;;  %v1021_v39 = vshll.u32 %v346_v30, 8  ;;  %v1023_v40 = vshll.u32 %v554_v31, 8 }
 0x112   :  { %v812_v34 = vadd.s32 4294967169, %v446_v29 }
 0x113   :  { %vm349_vm0 = vcmp.gt.s32.totalorder %v348_v28, 0  ;;  %vm557_vm1 = vcmp.gt.s32.totalorder %v556_v32, 0 }
 0x114   :  { %v350_v35 = vsel %vm349_vm0, %v348_v28, 0  ;;  %v558_v38 = vsel %vm557_vm1, %v556_v32, 0  ;;  %v1025_v41 = vadd.s32 1, %v812_v34 }
 0x115   :  { %v351_v36 = vshrl.u32 %v350_v35, 5  ;;  %v352_v37 = vand.u32 31, %v350_v35  ;;  %v1030_v46 = vshrl.u32 %v558_v38, 5  ;;  %v560_v47 = vand.u32 31, %v558_v38 }
 0x116   :  { %vm453_vm11 = vcmp.gt.s32.totalorder %v1025_v41, 0 }
 0x117   :  { %v353_v43 = vsub.s32 32, %v352_v37  ;;  %v355_v45 = vshll.u32 %v962_v44, %v352_v37  ;;  %v358_v49 = vshll.u32 %v963_v48, %v352_v37  ;;  %v361_v51 = vshll.u32 %v964_v50, %v352_v37 }
 0x118   :  { %v364_v53 = vshll.u32 %v965_v52, %v352_v37  ;;  %v367_v55 = vshll.u32 %v966_v54, %v352_v37  ;;  %vm370_vm2 = vcmp.lt.s32.totalorder %v351_v36, 1  ;;  %vm371_vm3 = vcmp.lt.s32.totalorder %v351_v36, 2 }
 0x119   :  { %v356_v56 = vshrl.u32 %v963_v48, %v353_v43  ;;  %v359_v57 = vshrl.u32 %v964_v50, %v353_v43  ;;  %v362_v58 = vshrl.u32 %v965_v52, %v353_v43  ;;  %v354_v59 = vshrl.u32 %v962_v44, %v353_v43 }
 0x11a   :  { %v365_v60 = vshrl.u32 %v966_v54, %v353_v43  ;;  %v368_v62 = vshrl.u32 %v967_v61, %v353_v43  ;;  %v561_v4 = vsub.s32 32, %v560_v47  ;;  %vm372_vm4 = vcmp.lt.s32.totalorder %v351_v36, 3 }
 0x11b   :  { %v357_v63 = vor.u32 %v356_v56, %v355_v45  ;;  %v360_v0 = vor.u32 %v359_v57, %v358_v49  ;;  %v363_v1 = vor.u32 %v362_v58, %v361_v51  ;;  %vm373_vm5 = vcmp.lt.s32.totalorder %v351_v36, 4 }
 0x11c   :  { %v366_v5 = vor.u32 %v365_v60, %v364_v53  ;;  %v369_v6 = vor.u32 %v368_v62, %v367_v55  ;;  %v563_v17 = vshll.u32 %v962_v44, %v560_v47  ;;  %v564_v22 = vshrl.u32 %v963_v48, %v561_v4 }
 0x11d   :  { %v374_v7 = vsel %vm370_vm2, %v354_v59, %v357_v63  ;;  %v375_v8 = vsel %vm373_vm5, %v363_v1, 2102212464  ;;  %v378_v9 = vsel %vm370_vm2, %v357_v63, %v360_v0  ;;  %v382_v10 = vsel %vm370_vm2, %v360_v0, %v363_v1 }
 0x11e   :  { %v376_v11 = vsel %vm372_vm4, %v360_v0, %v375_v8  ;;  %v379_v12 = vsel %vm373_vm5, %v366_v5, 920167782  ;;  %v383_v15 = vsel %vm373_vm5, %v369_v6, 1326507024  ;;  %v566_v23 = vshll.u32 %v963_v48, %v560_v47 }
 0x11f   :  { %v380_v19 = vsel %vm372_vm4, %v363_v1, %v379_v12  ;;  %v384_v21 = vsel %vm372_vm4, %v366_v5, %v383_v15  ;;  %v377_v24 = vsel %vm371_vm3, %v374_v7, %v376_v11  ;;  %v567_v27 = vshrl.u32 %v964_v50, %v561_v4  ;;  %v278_v15 = vpop.f32.mrf.mxu1 }
 0x120   :  { %v381_v25 = vsel %vm371_vm3, %v378_v9, %v380_v19  ;;  %v385_v26 = vsel %vm371_vm3, %v382_v10, %v384_v21  ;;  %v565_v32 = vor.u32 %v564_v22, %v563_v17  ;;  %v569_v34 = vshll.u32 %v964_v50, %v560_v47 }
 0x121   :  { %v1053_v28 = vmul.u32.u64.low %v1021_v39, %v385_v26  ;;  %v1054_v29 = vmul.u32.u64.high %v1021_v39, %v385_v26, %v1053_v28  ;;  %v1057_v30 = vmul.u32.u64.low %v1021_v39, %v381_v25  ;;  %v1058_v31 = vmul.u32.u64.high %v1021_v39, %v381_v25, %v1057_v30 }
 0x122   :  { %v568_v33 = vor.u32 %v567_v27, %v566_v23  ;;  %v570_v35 = vshrl.u32 %v965_v52, %v561_v4  ;;  %v562_v36 = vshrl.u32 %v962_v44, %v561_v4  ;;  %v572_v37 = vshll.u32 %v965_v52, %v560_v47 }
 0x123   :  { %v573_v38 = vshrl.u32 %v966_v54, %v561_v4  ;;  %v576_v43 = vshrl.u32 %v967_v61, %v561_v4  ;;  %v393_v45 = vmul.u32 %v1021_v39, %v377_v24  ;;  %v575_v51 = vshll.u32 %v966_v54, %v560_v47 }
 0x124   :  { %v571_v49 = vor.u32 %v570_v35, %v569_v34  ;;  %vm578_vm6 = vcmp.lt.s32.totalorder %v1030_v46, 1  ;;  %vm395_vm7 = vc.u32 %v1054_v29, %v1057_v30  ;;  %v396_v53 = vadd.s32 1, %v1058_v31 }
 0x125   :  { %v574_v55 = vor.u32 %v573_v38, %v572_v37  ;;  %vm579_vm8 = vcmp.lt.s32.totalorder %v1030_v46, 2  ;;  %v577_v56 = vor.u32 %v576_v43, %v575_v51  ;;  %vm580_vm9 = vcmp.lt.s32.totalorder %v1030_v46, 3 }
 0x126   :  { %vm581_vm10 = vcmp.lt.s32.totalorder %v1030_v46, 4  ;;  %v586_v57 = vsel %vm578_vm6, %v565_v32, %v568_v33  ;;  %v397_v39 = vsel %vm395_vm7, %v396_v53, %v1058_v31  ;;  %v590_v59 = vsel %vm578_vm6, %v568_v33, %v571_v49 }
 0x127   :  { %v583_v58 = vsel %vm581_vm10, %v571_v49, 2102212464  ;;  %v587_v47 = vsel %vm581_vm10, %v574_v55, 920167782  ;;  %v398_v60 = vadd.s32 %v397_v39, %v393_v45  ;;  %v582_v62 = vsel %vm578_vm6, %v562_v36, %v565_v32 }
 0x128   :  { %v588_v63 = vsel %vm580_vm9, %v571_v49, %v587_v47  ;;  %v591_v0 = vsel %vm581_vm10, %v577_v56, 1326507024  ;;  %v584_v1 = vsel %vm580_vm9, %v568_v33, %v583_v58  ;;  %v454_v12 = vsel %vm453_vm11, %v1025_v41, 0 }
 0x129   :  { %v589_v4 = vsel %vm579_vm8, %v586_v57, %v588_v63  ;;  %v592_v5 = vsel %vm580_vm9, %v574_v55, %v591_v0  ;;  %v399_v6 = vadd.s32 536870912, %v398_v60  ;;  %v585_v19 = vsel %vm579_vm8, %v582_v62, %v584_v1 }
 0x12a   :  { %v593_v7 = vsel %vm579_vm8, %v590_v59, %v592_v5  ;;  %v1083_v8 = vmul.u32.u64.low %v1023_v40, %v589_v4  ;;  %v1084_v9 = vmul.u32.u64.high %v1023_v40, %v589_v4, %v1083_v8  ;;  %v456_v21 = vand.u32 31, %v454_v12 }
 0x12b   :  { %v1088_v10 = vmul.u32.u64.low %v1023_v40, %v593_v7  ;;  %v1089_v11 = vmul.u32.u64.high %v1023_v40, %v593_v7, %v1088_v10  ;;  %v1092_v17 = vshrl.u32 %v399_v6, 30  ;;  %v442_v23 = vand.u32 2147483647, %v1013_v20 }
 0x12c   :  { %v604_v22 = vadd.s32 1, %v1084_v9  ;;  %v457_v24 = vsub.s32 32, %v456_v21  ;;  %v1099_v25 = vadd.f32 %v278_v15, %v1027_v42  ;;  %v601_v26 = vmul.u32 %v1023_v40, %v585_v19 }
 0x12d   :  { %vm603_vm12 = vc.u32 %v1089_v11, %v1083_v8  ;;  %v401_v41 = vshll.u32 %v1092_v17, 30  ;;  %v449_v32 = vand.u32 8388607, %v442_v23  ;;  %v455_v34 = vshrl.u32 %v454_v12, 5 }
 0x12e   :  { %v605_v27 = vsel %vm603_vm12, %v604_v22, %v1084_v9  ;;  %v460_v28 = vshrl.u32 %v963_v48, %v457_v24  ;;  %v463_v31 = vshrl.u32 %v964_v50, %v457_v24  ;;  %v466_v42 = vshrl.u32 %v965_v52, %v457_v24 }
 0x12f   :  { %v606_v46 = vadd.s32 %v605_v27, %v601_v26  ;;  %v653_v33 = vand.u32 2139095040, %v1099_v25  ;;  %v459_v35 = vshll.u32 %v962_v44, %v456_v21  ;;  %v462_v36 = vshll.u32 %v963_v48, %v456_v21 }
 0x130   :  { %v1114_v37 = vsub.s32 %v398_v60, %v401_v41  ;;  %v465_v38 = vshll.u32 %v964_v50, %v456_v21  ;;  %v468_v43 = vshll.u32 %v965_v52, %v456_v21  ;;  %v469_v45 = vshrl.u32 %v966_v54, %v457_v24 }
 0x131   :  { %v607_v40 = vadd.s32 536870912, %v606_v46  ;;  %v461_v51 = vor.u32 %v460_v28, %v459_v35  ;;  %v464_v53 = vor.u32 %v463_v31, %v462_v36  ;;  %v472_v55 = vshrl.u32 %v967_v61, %v457_v24 }
 0x132   :  { %v467_v56 = vor.u32 %v466_v42, %v465_v38  ;;  %v470_v57 = vor.u32 %v469_v45, %v468_v43  ;;  %v654_v39 = vshrl.u32 %v653_v33, 23  ;;  %v450_v47 = vor.u32 8388608, %v449_v32 }
 0x133   :  { %v1119_v49 = vshrl.u32 %v607_v40, 30  ;;  %v471_v59 = vshll.u32 %v966_v54, %v456_v21  ;;  %v404_v60 = vsub.s32 0, %v1114_v37  ;;  %vm474_vm13 = vcmp.lt.s32.totalorder %v455_v34, 1 }
 0x134   :  { %vm476_vm14 = vcmp.lt.s32.totalorder %v455_v34, 3  ;;  %vm477_vm15 = vcmp.lt.s32.totalorder %v455_v34, 4  ;;  %v482_v0 = vsel %vm474_vm13, %v461_v51, %v464_v53  ;;  %v820_v5 = vadd.s32 4294967169, %v654_v39 }
 0x135   :  { %v609_v58 = vshll.u32 %v1119_v49, 30  ;;  %v473_v63 = vor.u32 %v472_v55, %v471_v59  ;;  %v483_v1 = vsel %vm477_vm15, %v470_v57, 920167782  ;;  %v458_v6 = vshrl.u32 %v962_v44, %v457_v24 }
 0x136   :  { %v484_v4 = vsel %vm476_vm14, %v467_v56, %v483_v1  ;;  %vm475_vm0 = vcmp.lt.s32.totalorder %v455_v34, 2  ;;  %v479_v7 = vsel %vm477_vm15, %v467_v56, 2102212464  ;;  %v809_v9 = vmin.u32 %v404_v60, %v1114_v37 }
 0x137   :  { %v1125_v62 = vsub.s32 %v606_v46, %v609_v58  ;;  %v485_v12 = vsel %vm475_vm0, %v482_v0, %v484_v4  ;;  %v486_v15 = vsel %vm474_vm13, %v464_v53, %v467_v56  ;;  %v487_v19 = vsel %vm477_vm15, %v473_v63, 1326507024 }
 0x138   :  { %v490_v21 = vshll.u32 %v450_v47, 8  ;;  %v478_v22 = vsel %vm474_vm13, %v458_v6, %v461_v51  ;;  %v480_v26 = vsel %vm476_vm14, %v464_v53, %v479_v7  ;;  %v488_v41 = vsel %vm476_vm14, %v470_v57, %v487_v19 }
 0x139   :  { %v612_v10 = vsub.s32 0, %v1125_v62  ;;  %v660_v27 = vadd.s32 1, %v820_v5  ;;  %v489_v24 = vsel %vm475_vm0, %v486_v15, %v488_v41  ;;  %v406_v31 = vclz %v809_v9 }
 0x13a   :  { %v1138_v46 = vmul.u32.u64.low %v490_v21, %v485_v12  ;;  %v1139_v28 = vmul.u32.u64.high %v490_v21, %v485_v12, %v1138_v46  ;;  %v1143_v42 = vmul.u32.u64.low %v490_v21, %v489_v24  ;;  %v1144_v33 = vmul.u32.u64.high %v490_v21, %v489_v24, %v1143_v42 }
 0x13b   :  { %v817_v32 = vmin.u32 %v612_v10, %v1125_v62  ;;  %v481_v40 = vsel %vm475_vm0, %v478_v22, %v480_v26  ;;  %vm661_vm1 = vcmp.gt.s32.totalorder %v660_v27, 0  ;;  %v810_v43 = vadd.s32 4294967294, %v406_v31 }
 0x13c   :  { %v662_v35 = vsel %vm661_vm1, %v660_v27, 0  ;;  %v500_v36 = vadd.s32 1, %v1139_v28  ;;  %v497_v51 = vmul.u32 %v490_v21, %v481_v40  ;;  %vm499_vm2 = vc.u32 %v1144_v33, %v1138_v46 }
 0x13d   :  { %v664_v38 = vand.u32 31, %v662_v35  ;;  %v614_v45 = vclz %v817_v32  ;;  %v650_v57 = vand.u32 2147483647, %v1099_v25  ;;  %vm811_vm3 = vcmp.lt.s32.totalorder %v810_v43, 0 }
 0x13e   :  { %v501_v53 = vsel %vm499_vm2, %v500_v36, %v1139_v28  ;;  %v1157_v63 = vsel %vm811_vm3, 0, %v810_v43  ;;  %v663_v6 = vshrl.u32 %v662_v35, 5  ;;  %vm444_vm11 = vcmp.lt.s32.totalorder %v1013_v20, 0 }
 0x13f   :  { %v502_v55 = vadd.s32 %v501_v53, %v497_v51  ;;  %v665_v56 = vsub.s32 32, %v664_v38  ;;  %v818_v34 = vadd.s32 4294967294, %v614_v45  ;;  %v657_v0 = vand.u32 8388607, %v650_v57 }
 0x140   :  { %v667_v1 = vshll.u32 %v962_v44, %v664_v38  ;;  %v670_v4 = vshll.u32 %v963_v48, %v664_v38  ;;  %v673_v7 = vshll.u32 %v964_v50, %v664_v38  ;;  %v676_v12 = vshll.u32 %v965_v52, %v664_v38 }
 0x141   :  { %v503_v39 = vadd.s32 536870912, %v502_v55  ;;  %v668_v58 = vshrl.u32 %v963_v48, %v665_v56  ;;  %v671_v47 = vshrl.u32 %v964_v50, %v665_v56  ;;  %v674_v60 = vshrl.u32 %v965_v52, %v665_v56 }
 0x142   :  { %vm819_vm4 = vcmp.lt.s32.totalorder %v818_v34, 0  ;;  %v677_v15 = vshrl.u32 %v966_v54, %v665_v56  ;;  %v680_v22 = vshrl.u32 %v967_v61, %v665_v56  ;;  %v658_v26 = vor.u32 8388608, %v657_v0 }
 0x143   :  { %v1154_v59 = vshrl.u32 %v503_v39, 30  ;;  %v669_v9 = vor.u32 %v668_v58, %v667_v1  ;;  %v672_v10 = vor.u32 %v671_v47, %v670_v4  ;;  %v675_v21 = vor.u32 %v674_v60, %v673_v7 }
 0x144   :  { %v678_v41 = vor.u32 %v677_v15, %v676_v12  ;;  %v679_v48 = vshll.u32 %v966_v54, %v664_v38  ;;  %v414_v27 = vsub.s32 4294967266, %v1157_v63  ;;  %v1170_v24 = vsel %vm819_vm4, 0, %v818_v34 }
 0x145   :  { %v505_v5 = vshll.u32 %v1154_v59, 30  ;;  %vm682_vm5 = vcmp.lt.s32.totalorder %v663_v6, 1  ;;  %v666_v50 = vshrl.u32 %v962_v44, %v665_v56  ;;  %vm685_vm6 = vcmp.lt.s32.totalorder %v663_v6, 4 }
 0x146   :  { %v681_v31 = vor.u32 %v680_v22, %v679_v48  ;;  %v690_v52 = vsel %vm682_vm5, %v669_v9, %v672_v10  ;;  %vm684_vm7 = vcmp.lt.s32.totalorder %v663_v6, 3  ;;  %v687_v42 = vsel %vm685_vm6, %v675_v21, 2102212464 }
 0x147   :  { %v506_v19 = vsub.s32 %v502_v55, %v505_v5  ;;  %v691_v61 = vsel %vm685_vm6, %v678_v41, 920167782  ;;  %v622_v40 = vsub.s32 4294967266, %v1170_v24  ;;  %vm683_vm8 = vcmp.lt.s32.totalorder %v663_v6, 2 }
 0x148   :  { %v692_v54 = vsel %vm684_vm7, %v675_v21, %v691_v61  ;;  %v698_v35 = vshll.u32 %v658_v26, 8  ;;  %v686_v38 = vsel %vm682_vm5, %v666_v50, %v669_v9  ;;  %v694_v44 = vsel %vm682_vm5, %v672_v10, %v675_v21 }
 0x149   :  { %v508_v28 = vsub.s32 0, %v506_v19  ;;  %v693_v43 = vsel %vm683_vm8, %v690_v52, %v692_v54  ;;  %v688_v45 = vsel %vm684_vm7, %v672_v10, %v687_v42  ;;  %v695_v51 = vsel %vm685_vm6, %v681_v31, 1326507024 }
 0x14a   :  { %v1180_v53 = vmul.u32.u64.low %v698_v35, %v693_v43  ;;  %v1181_v55 = vmul.u32.u64.high %v698_v35, %v693_v43, %v1180_v53  ;;  %v415_v56 = vadd.s32 127, %v414_v27  ;;  %v696_v39 = vsel %vm684_vm7, %v678_v41, %v695_v51 }
 0x14b   :  { %v813_v32 = vmin.u32 %v508_v28, %v506_v19  ;;  %v410_v58 = vsub.s32 32, %v1157_v63  ;;  %v697_v47 = vsel %vm683_vm8, %v694_v44, %v696_v39  ;;  %v689_v60 = vsel %vm683_vm8, %v686_v38, %v688_v45 }
 0x14c   :  { %v1188_v0 = vmul.u32.u64.low %v698_v35, %v697_v47  ;;  %v1189_v1 = vmul.u32.u64.high %v698_v35, %v697_v47, %v1188_v0  ;;  %v394_v4 = vadd.s32 %v1057_v30, %v1054_v29  ;;  %v623_v5 = vadd.s32 127, %v622_v40 }
 0x14d   :  { %v510_v36 = vclz %v813_v32  ;;  %v708_v9 = vadd.s32 1, %v1181_v55  ;;  %v416_v10 = vshll.u32 %v415_v56, 23  ;;  %v498_v12 = vadd.s32 %v1138_v46, %v1144_v33 }
 0x14e   :  { %v412_v22 = vshrl.u32 %v394_v4, %v410_v58  ;;  %v618_v6 = vsub.s32 32, %v1170_v24  ;;  %v705_v26 = vmul.u32 %v698_v35, %v689_v60  ;;  %vm707_vm10 = vc.u32 %v1189_v1, %v1180_v53 }
 0x14f   :  { %v814_v34 = vadd.s32 4294967294, %v510_v36  ;;  %v411_v29 = vshll.u32 %v1114_v37, %v1157_v63  ;;  %v602_v30 = vadd.s32 %v1083_v8, %v1089_v11  ;;  %v624_v28 = vshll.u32 %v623_v5, 23 }
 0x150   :  { %v709_v46 = vsel %vm707_vm10, %v708_v9, %v1181_v55  ;;  %v417_v33 = vor.u32 4788187, %v416_v10  ;;  %v619_v40 = vshll.u32 %v1125_v62, %v1170_v24  ;;  %vm340_vm12 = vcmp.lt.s32.totalorder %v1005_v13, 0 }
 0x151   :  { %vm815_vm9 = vcmp.lt.s32.totalorder %v814_v34, 0  ;;  %v710_v52 = vadd.s32 %v709_v46, %v705_v26  ;;  %v620_v32 = vshrl.u32 %v602_v30, %v618_v6  ;;  %v625_v54 = vor.u32 4788187, %v624_v28 }
 0x152   :  { %v513_v7 = vsel %vm815_vm9, 0, %v814_v34  ;;  %v418_v35 = vand.u32 2147483647, %v417_v33  ;;  %vm1217_vm13 = vcmp.le.f32.partialorder %v442_v23, 0.7853982  ;;  %vm548_vm15 = vcmp.lt.s32.totalorder %v1007_v14, 0 }
 0x153   :  { %v514_v15 = vsub.s32 32, %v513_v7  ;;  %v518_v21 = vsub.s32 4294967266, %v513_v7  ;;  %v515_v41 = vshll.u32 %v506_v19, %v513_v7  ;;  %v413_v19 = vor.u32 %v412_v22, %v411_v29 }
 0x154   :  { %v711_v61 = vadd.s32 536870912, %v710_v52  ;;  %v621_v8 = vor.u32 %v620_v32, %v619_v40  ;;  %v626_v44 = vand.u32 2147483647, %v625_v54  ;;  %vm1226_vm14 = vcmp.le.f32.partialorder %v338_v16, 0.7853982 }
 0x155   :  { %v516_v48 = vshrl.u32 %v498_v12, %v514_v15  ;;  %v519_v27 = vadd.s32 127, %v518_v21  ;;  %v420_v11 = vcvt.s32.f32 %v413_v19  ;;  %v706_v15 = vadd.s32 %v1180_v53, %v1189_v1 }
 0x156   :  { %v1206_v36 = vshrl.u32 %v711_v61, 30  ;;  %v628_v55 = vcvt.s32.f32 %v621_v8  ;;  %v424_v22 = vsub.s32 4, %v1092_v17  ;;  %vm1241_vm1 = vcmp.le.f32.partialorder %v546_v18, 0.7853982 }
 0x157   :  { %v517_v50 = vor.u32 %v516_v48, %v515_v41  ;;  %v520_v31 = vshll.u32 %v519_v27, 23  ;;  %v421_v45 = vmul.f32 %v420_v11, %v418_v35  ;;  %v528_v26 = vsub.s32 4, %v1154_v59 }
 0x158   :  { %v713_v43 = vshll.u32 %v1206_v36, 30  ;;  %v629_v39 = vmul.f32 %v628_v55, %v626_v44  ;;  %v425_v18 = vsel %vm340_vm12, %v424_v22, %v1092_v17  ;;  %v632_v46 = vsub.s32 4, %v1119_v49 }
 0x159   :  { %v521_v42 = vor.u32 4788187, %v520_v31  ;;  %v524_v63 = vcvt.s32.f32 %v517_v50  ;;  %v422_v58 = vxor.u32 2147483648, %v421_v45  ;;  %v529_v30 = vsel %vm444_vm11, %v528_v26, %v1154_v59 }
 0x15a   :  { %v714_v51 = vsub.s32 %v710_v52, %v713_v43  ;;  %v630_v60 = vxor.u32 2147483648, %v629_v39  ;;  %v427_v31 = vsel %vm1226_vm14, 0, %v425_v18  ;;  %v531_v52 = vsel %vm1217_vm13, 0, %v529_v30 }
 0x15b   :  { %v522_v37 = vand.u32 2147483647, %v521_v42  ;;  %v423_v0 = vsel %vm340_vm12, %v422_v58, %v421_v45  ;;  %v431_v19 = vadd.s32 3, %v427_v31  ;;  %v633_v17 = vsel %vm548_vm15, %v632_v46, %v1119_v49 }
 0x15c   :  { %v716_v34 = vsub.s32 0, %v714_v51  ;;  %v426_v23 = vsel %vm1226_vm14, %v1005_v13, %v423_v0  ;;  %v631_v10 = vsel %vm548_vm15, %v630_v60, %v629_v39  ;;  %v535_v42 = vadd.s32 3, %v531_v52 }
 0x15d   :  { %v525_v38 = vmul.f32 %v524_v63, %v522_v37  ;;  %v634_v53 = vsel %vm1241_vm1, %v1007_v14, %v631_v10  ;;  %vm652_vm2 = vcmp.lt.s32.totalorder %v1099_v25, 0  ;;  %v736_v40 = vsub.s32 4, %v1206_v36 }
 0x15e   :  { %v821_v62 = vmin.u32 %v716_v34, %v714_v51  ;;  %vm1267_vm3 = vcmp.le.f32.partialorder %v650_v57, 0.7853982  ;;  %v282_v63 = vand.u32 127, %v119_v2  ;;  %v635_v49 = vsel %vm1241_vm1, 0, %v633_v17 }
 0x15f   :  { %v526_v56 = vxor.u32 2147483648, %v525_v38  ;;  %v432_v43 = vand.u32 3, %v431_v19  ;;  %v536_v44 = vand.u32 3, %v535_v42  ;;  %v737_v57 = vsel %vm652_vm2, %v736_v40, %v1206_v36 }
 0x160   :  { %v718_v47 = vclz %v821_v62  ;;  %v283_v45 = vadd.s32 128, %v282_v63  ;;  %v284_v58 = vadd.s32 256, %v282_v63  ;;  %v285_v62 = vadd.s32 384, %v282_v63 }
 0x161   :  { %v527_v24 = vsel %vm444_vm11, %v526_v56, %v525_v38  ;;  %v639_v56 = vadd.s32 3, %v635_v49  ;;  %v739_v60 = vsel %vm1267_vm3, 0, %v737_v57  ;;  %vm538_vm4 = vcmp.eq.s32.totalorder %v536_v44, 0 }
 0x162   :  { %v822_v5 = vadd.s32 4294967294, %v718_v47  ;;  %v530_v7 = vsel %vm1217_vm13, %v1013_v20, %v527_v24  ;;  %v297_v0 = vand.u32 31, %v283_v45  ;;  %vm541_vm5 = vcmp.eq.s32.totalorder %v536_v44, 2 }
 0x163   :  { %854 = vcosq.f32 %v530_v7  ;;  %vm434_vm6 = vcmp.eq.s32.totalorder %v432_v43, 0  ;;  %v640_v36 = vand.u32 3, %v639_v56  ;;  %vm437_vm7 = vcmp.eq.s32.totalorder %v432_v43, 2 }
 0x164   :  { %vm823_vm0 = vcmp.lt.s32.totalorder %v822_v5, 0  ;;  %856 = vsinq.f32 %v530_v7  ;;  %vm537_vm8 = vcmp.lt.s32.totalorder %v536_v44, 2  ;;  %v743_v9 = vadd.s32 3, %v739_v60 }
 0x165   :  { %v721_v12 = vsel %vm823_vm0, 0, %v822_v5  ;;  %858 = vsinq.f32 %v426_v23  ;;  %v304_v6 = vand.u32 31, %v284_v58  ;;  %v311_v26 = vand.u32 31, %v285_v62 }
 0x166   :  { %v722_v21 = vsub.s32 32, %v721_v12  ;;  %v726_v16 = vsub.s32 4294967266, %v721_v12  ;;  %v723_v41 = vshll.u32 %v714_v51, %v721_v12  ;;  %860 = vcosq.f32 %v426_v23 }
 0x167   :  { %862 = vcosq.f32 %v634_v53  ;;  %vm1280_vm9 = vcmp.lt.s32.totalorder %v297_v0, 31  ;;  %vm433_vm10 = vcmp.lt.s32.totalorder %v432_v43, 2  ;;  %vm534_vm11 = vweird.f32 %v1013_v20 }
 0x168   :  { %v724_v48 = vshrl.u32 %v706_v15, %v722_v21  ;;  %v727_v27 = vadd.s32 127, %v726_v16  ;;  %864 = vsinq.f32 %v634_v53  ;;  %v290_v15 = vand.u32 31, %v282_v63 }
 0x169   :  { %v968_v16 = vmov 1966171168   ;;  %vm642_vm12 = vcmp.eq.s32.totalorder %v640_v36, 0  ;;  %vm645_vm13 = vcmp.eq.s32.totalorder %v640_v36, 2  ;;  %vm430_vm14 = vweird.f32 %v1005_v13 }
 0x16a   :  { %v725_v1 = vor.u32 %v724_v48, %v723_v41  ;;  %v728_v29 = vshll.u32 %v727_v27, 23  ;;  %v765_v22 = vunpack.c.l.s4 %v968_v16  ;;  %v744_v27 = vand.u32 3, %v743_v9 }
 0x16b   :  { %vm1286_vm15 = vcmp.lt.s32.totalorder %v290_v15, 31  ;;  %vm641_vm0 = vcmp.lt.s32.totalorder %v640_v36, 2  ;;  %vm1290_vm1 = vcmp.lt.s32.totalorder %v304_v6, 31 }
 0x16c   :  { %v729_v28 = vor.u32 4788187, %v728_v29  ;;  %v732_v50 = vcvt.s32.f32 %v725_v1  ;;  %v766_v18 = vunpack.c.0.s8 %v765_v22 }
 0x16e   :  { %v730_v33 = vand.u32 2147483647, %v729_v28 }
 0x170   :  { %v733_v32 = vmul.f32 %v732_v50, %v730_v33  ;;  %v855_v61 = vpop.eup %854 }
 0x171   :  { %v857_v54 = vpop.eup %856  ;;  %v542_v55 = vxor.u32 2147483648, %v855_v61 }
 0x172   :  { %v734_v59 = vxor.u32 2147483648, %v733_v32  ;;  %v859_v8 = vpop.eup %858  ;;  %v539_v51 = vxor.u32 2147483648, %v857_v54 }
 0x173   :  { %v861_v38 = vpop.eup %860  ;;  %v435_v34 = vxor.u32 2147483648, %v859_v8  ;;  %v543_v5 = vsel %vm541_vm5, %v542_v55, %v857_v54  ;;  %vm746_vm5 = vcmp.eq.s32.totalorder %v744_v27, 0 }
 0x174   :  { %v735_v37 = vsel %vm652_vm2, %v734_v59, %v733_v32  ;;  %v863_v39 = vpop.eup %862  ;;  %v438_v24 = vxor.u32 2147483648, %v861_v38  ;;  %v540_v4 = vsel %vm538_vm4, %v855_v61, %v539_v51  ;;  %vm1297_vm2 = vcmp.lt.s32.totalorder %v311_v26, 31 }
 0x175   :  { %v738_v11 = vsel %vm1267_vm3, %v1099_v25, %v735_v37  ;;  %v865_v47 = vpop.eup %864  ;;  %v436_v7 = vsel %vm434_vm6, %v861_v38, %v435_v34  ;;  %v646_v12 = vxor.u32 2147483648, %v863_v39  ;;  %v544_v21 = vsel %vm537_vm8, %v540_v4, %v543_v5 }
 0x176   :  { %866 = vcosq.f32 %v738_v11  ;;  %v439_v23 = vsel %vm437_vm7, %v438_v24, %v859_v8  ;;  %v643_v10 = vxor.u32 2147483648, %v865_v47  ;;  %v545_v53 = vsel %vm534_vm11, nan, %v544_v21 }
 0x177   :  { %868 = vsinq.f32 %v738_v11  ;;  %v440_v48 = vsel %vm433_vm10, %v436_v7, %v439_v23  ;;  %v647_v29 = vsel %vm645_vm13, %v646_v12, %v865_v47  ;;  %v755_v32 = vsel %vm1280_vm9, %v545_v53, %v1013_v20 }
 0x178   :  { %v644_v1 = vsel %vm642_vm12, %v863_v39, %v643_v10  ;;  %v441_v46 = vsel %vm430_vm14, nan, %v440_v48  ;;  %vm638_vm3 = vweird.f32 %v1007_v14  ;;  %vm749_vm4 = vcmp.eq.s32.totalorder %v744_v27, 2 }
 0x179   :  { %v648_v31 = vsel %vm641_vm0, %v644_v1, %v647_v29  ;;  %v754_v59 = vsel %vm1286_vm15, %v441_v46, %v1005_v13  ;;  %v769_v61 = vsub.s32 %v766_v18, %v1000_v3  ;;  %vm745_vm6 = vcmp.lt.s32.totalorder %v744_v27, 2 }
 0x17a   :  { %v649_v40 = vsel %vm638_vm3, nan, %v648_v31  ;;  %v762_v20 = vcombine.low %v754_v59, %v755_v32  ;;  %vm742_vm7 = vweird.f32 %v1099_v25  ;;  %vm789_vm8 = vcmp.lt.s32.totalorder %v119_v2, 512 }
 0x17b   :  { %v756_v63 = vsel %vm1290_vm1, %v649_v40, %v1007_v14 }
 0x17c   :  { %v770_v13 = vrot.slane %v762_v20, %v769_v61 }
 0x183   :  { %v867_v30 = vpop.eup %866 }
 0x184   :  { %v869_v33 = vpop.eup %868  ;;  %v750_v52 = vxor.u32 2147483648, %v867_v30 }
 0x185   :  { %v747_v17 = vxor.u32 2147483648, %v869_v33 }
 0x186   :  { %v751_v42 = vsel %vm749_vm4, %v750_v52, %v869_v33 }
 0x187   :  { %v748_v54 = vsel %vm746_vm5, %v867_v30, %v747_v17 }
 0x188   :  { %v752_v35 = vsel %vm745_vm6, %v748_v54, %v751_v42 }
 0x189   :  { %v753_v37 = vsel %vm742_vm7, nan, %v752_v35 }
 0x18a   :  { %v757_v8 = vsel %vm1297_vm2, %v753_v37, %v1099_v25 }
 0x18b   :  { %v763_v49 = vcombine.low %v756_v63, %v757_v8 }
 0x18d   :  { %v777_v11 = vrot.slane %v763_v49, %v769_v61 }
 0x18f   :  { %v778_v3 = vcombine.low %v770_v13, %v777_v11 }
 0x191   :  { %v785_v38 = vrot.slane %v778_v3, %v769_v61 }
 0x193   :  { %791 = vst.msk [vmem:[#allocation8] sm:$0xf] %vm789_vm8, %v785_v38 }
 0x194   :  { %941 = shalt.err (!%p938_p5)
}
 0x195   :  { %801 = dma.vmem_to_hbm [thread:$0]  %s799_s2, 64, %s1320_s3, [#allocation4]  }
 0x196   :  { %954 = dma.done.wait [#allocation4], 64  }
 0x197   :  { %955 = vsyncadd [#allocation4], 4294967232 }
 0x198   :  { %805 = vsyncpa [#allocation3], 1 }
 0x199   :  { %806 = vsyncpa [#allocation6], 1 }
 0x19a   :  { %807 = vsyncpa [#allocation4], 1 }

</bundles_post_ra>
